<compile_context>
chip_gen: v5e
topology: v5e:2x2
jax: 0.10.0
libtpu: 0.0.40
codegen_flags: <defaults>
</compile_context>

<pallas_src>
import functools

import jax
import jax.numpy as jnp
from jax.experimental import pallas as pl
from jax.experimental.pallas import tpu as pltpu


def _round_up(n, m):
    return ((n + m - 1) // m) * m


def attention_block_kernel(x_ref, w_ref, b_ref, gamma_ref, o_ref, *, cq_pad, c):
    bb, C, T = x_ref.shape
    ctot_pad = w_ref.shape[1]

    # x arrives in its native (B, C, T) layout (no wrapper HBM transpose);
    # relayout to channels-on-lanes on the VMEM tile (XLU slot, ~free vs MXU).
    x_ct = x_ref[...]                                    # (bb, C, T) f32
    x_tc = jnp.swapaxes(x_ct, 1, 2)                      # (bb, T, C) f32

    w = w_ref[...]                                       # (C, ctot_pad) bf16
    b = b_ref[...]                                       # (1, ctot_pad) f32

    # Fused, lane-padded q/k/v projection: one wide MXU matmul (bf16 in,
    # f32 accumulate) instead of three skinny ones.
    proj = jnp.einsum('btc,co->bto',
                      x_tc.astype(jnp.bfloat16), w,
                      preferred_element_type=jnp.float32) + b   # (bb,T,ctot_pad)

    # 128-lane-aligned slices: zero-cost views; padded zero columns are inert.
    q = proj[:, :, :cq_pad]                              # (bb, T, cq_pad)
    k = proj[:, :, cq_pad:2 * cq_pad]                    # (bb, T, cq_pad)
    v = proj[:, :, 2 * cq_pad:]                          # (bb, T, c_pad)

    # Attention scores: s[b, t, s'] = sum_c q[b, t, c] * k[b, s', c]
    s = jnp.einsum('btc,bsc->bts',
                   q.astype(jnp.bfloat16), k.astype(jnp.bfloat16),
                   preferred_element_type=jnp.float32)   # (bb, T, T)

    # Softmax over the last axis as one f32 chain (single live (bb,T,T) value);
    # reciprocal rides the EUP slot; probabilities go to bf16 for the MXU.
    p = jnp.exp(s - jnp.max(s, axis=-1, keepdims=True))
    p = (p * pl.reciprocal(jnp.sum(p, axis=-1, keepdims=True), approx=True)
         ).astype(jnp.bfloat16)

    # out[b, t, c] = sum_s p[b, t, s] * v[b, s, c]
    out = jnp.einsum('bts,bsc->btc', p, v.astype(jnp.bfloat16),
                     preferred_element_type=jnp.float32)         # (bb,T,c_pad)

    gamma = gamma_ref[0]
    y_tc = gamma * out[:, :, :c] + x_tc                           # (bb, T, C) f32
    # Store back in the native (B, C, T) layout (in-kernel XLU transpose).
    o_ref[...] = jnp.swapaxes(y_tc, 1, 2).astype(o_ref.dtype)


def _tpu_hw():
    """Best-effort (vmem_capacity_bytes, num_tensorcores) of the local TPU."""
    kind = ""
    try:
        kind = jax.devices()[0].device_kind.lower()
    except Exception:
        pass
    vmem = None
    try:
        vmem = int(pltpu.get_tpu_info().vmem_capacity_bytes)
    except Exception:
        pass
    if vmem is None:
        # Conservative fallback: 64 MiB unless we positively know a 128 MiB part.
        vmem = (128 * 1024 * 1024
                if any(t in kind for t in ("v5", "v6")) and "v7" not in kind
                else 64 * 1024 * 1024)
    # v5e / v6e have a single TensorCore; v7x (and megacore parts) have 2 and
    # shard "parallel" grid axes across them -> keep the grid >= 2 steps there.
    single_tc = any(t in kind for t in ("v5e", "v5 lite", "v6e", "v6 lite", "lite"))
    num_tc = 1 if single_tc else 2
    return vmem, num_tc


def _per_batch_bytes(C, T, ctot_pad, c_pad):
    return (4 * T * C * 3                       # x_ct tile, x_tc copy, y tile (f32)
            + 4 * T * ctot_pad                  # fused projection (f32)
            + 8 * T * T                         # scores/exp chain (f32)
            + 4 * T * c_pad                     # attention output (f32)
            + 2 * T * (C + ctot_pad + T + c_pad))   # bf16 temporaries


def _pick_batch_block(B, C, T, ctot_pad, c_pad, vmem_cap, num_tc):
    # Generation-aware per-step budget: bigger steps on 128 MiB parts (v5e/v6e)
    # to amortize the ~0.35us/step overhead; tighter on v7x (64 MiB physical).
    budget = (16 * 1024 * 1024 if vmem_cap >= 100 * 1024 * 1024
              else 6 * 1024 * 1024)
    per_b = _per_batch_bytes(C, T, ctot_pad, c_pad)
    bb = max(1, min(B, budget // max(per_b, 1)))
    if num_tc > 1 and B >= num_tc:
        # Keep at least num_tc grid steps so every TensorCore gets work.
        bb = min(bb, max(1, B // num_tc))
    # Prefer a bb that divides B (no masked tail block) unless it costs >2x;
    # otherwise rely on pl.cdiv + Pallas' masked tail handling.
    div = bb
    while B % div:
        div -= 1
    if div * 2 >= bb:
        bb = div
    return bb


def _vmem_limit_bytes(bb, C, T, ctot_pad, c_pad, vmem_cap):
    # Leave headroom below physical VMEM: ~52 MiB on 64 MiB parts (v7x),
    # ~100 MiB on 128 MiB parts (v5e/v6e). Never below the known-safe 32 MiB.
    cap = (100 * 1024 * 1024 if vmem_cap >= 100 * 1024 * 1024
           else 52 * 1024 * 1024)
    blocks = 4 * bb * T * C * 2 * 2                      # x + y tiles, double-buffered
    weights = 2 * C * ctot_pad + 4 * ctot_pad            # bf16 W + f32 bias
    interm = bb * _per_batch_bytes(C, T, ctot_pad, c_pad)
    need = blocks + 2 * weights + interm
    return int(min(cap, max(32 * 1024 * 1024, 2 * need)))


def _build_pallas_call(B, C, T, bb, cq_pad, ctot_pad, out_dtype, vmem_limit,
                       single_buffer_weights):
    kernel = functools.partial(attention_block_kernel, cq_pad=cq_pad, c=C)
    grid = (pl.cdiv(B, bb),)

    if single_buffer_weights:
        # Constant index_map => the second pipeline buffer is pure VMEM waste.
        w_spec = pl.BlockSpec((C, ctot_pad), lambda i: (0, 0),
                              pipeline_mode=pl.Buffered(1))
        b_spec = pl.BlockSpec((1, ctot_pad), lambda i: (0, 0),
                              pipeline_mode=pl.Buffered(1))
    else:
        w_spec = pl.BlockSpec((C, ctot_pad), lambda i: (0, 0))
        b_spec = pl.BlockSpec((1, ctot_pad), lambda i: (0, 0))

    grid_spec = pltpu.PrefetchScalarGridSpec(
        num_scalar_prefetch=0,
        grid=grid,
        in_specs=[
            pl.BlockSpec((bb, C, T), lambda i: (i, 0, 0)),      # x, native (B,C,T)
            w_spec,                                             # fused padded [Wq|Wk|Wv]^T
            b_spec,                                             # fused padded bias row
            pl.BlockSpec(memory_space=pltpu.MemorySpace.SMEM),  # gamma scalar
        ],
        out_specs=pl.BlockSpec((bb, C, T), lambda i: (i, 0, 0)),  # y, native (B,C,T)
    )
    return pl.pallas_call(
        kernel,
        out_shape=jax.ShapeDtypeStruct((B, C, T), out_dtype),
        grid_spec=grid_spec,
        compiler_params=pltpu.CompilerParams(
            dimension_semantics=("parallel",),
            vmem_limit_bytes=vmem_limit),
    )


def attention_block(x, wq, bq, wk, bk, wv, bv, gamma):
    B, C, T = x.shape
    cq = wq.shape[0]

    # Pad each q/k/v segment of the fused weight to a 128-lane boundary so the
    # in-kernel q/k/v slices are lane-aligned views (no relayout copies).
    cq_pad = _round_up(cq, 128)
    c_pad = _round_up(C, 128)
    ctot_pad = 2 * cq_pad + c_pad

    w = jnp.zeros((C, ctot_pad), jnp.float32)
    w = w.at[:, :cq].set(wq.T)
    w = w.at[:, cq_pad:cq_pad + cq].set(wk.T)
    w = w.at[:, 2 * cq_pad:2 * cq_pad + C].set(wv.T)
    w = w.astype(jnp.bfloat16)                       # MXU input, f32 accumulate

    b = jnp.zeros((1, ctot_pad), jnp.float32)
    b = b.at[0, :cq].set(bq)
    b = b.at[0, cq_pad:cq_pad + cq].set(bk)
    b = b.at[0, 2 * cq_pad:2 * cq_pad + C].set(bv)

    gamma1 = gamma.reshape(1).astype(jnp.float32)

    vmem_cap, num_tc = _tpu_hw()
    bb = _pick_batch_block(B, C, T, ctot_pad, c_pad, vmem_cap, num_tc)
    vmem_limit = _vmem_limit_bytes(bb, C, T, ctot_pad, c_pad, vmem_cap)
    # TODO(synk): if _per_batch_bytes exceeds the per-step budget even at bb=1
    # (large T), switch to the flash-style T-tiled path described in the header.

    try:
        call = _build_pallas_call(B, C, T, bb, cq_pad, ctot_pad, x.dtype,
                                  vmem_limit, single_buffer_weights=True)
        return call(x, w, b, gamma1)
    except Exception:
        # Fallback if this toolchain rejects pl.Buffered(1) single-buffering.
        call = _build_pallas_call(B, C, T, bb, cq_pad, ctot_pad, x.dtype,
                                  vmem_limit, single_buffer_weights=False)
        return call(x, w, b, gamma1)


def attention_block_ref(x, wq, bq, wk, bk, wv, bv, gamma):
    # pure-JAX (f32) reference mirroring the PyTorch forward
    q = jnp.einsum('oc,bct->bot', wq, x) + bq[None, :, None]   # (B, Cq, T)
    k = jnp.einsum('oc,bct->bot', wk, x) + bk[None, :, None]   # (B, Cq, T)
    v = jnp.einsum('oc,bct->bot', wv, x) + bv[None, :, None]   # (B, C, T)
    attn = jnp.einsum('bct,bcs->bts', q, k)                    # (B, T, T)
    attn = jax.nn.softmax(attn, axis=-1)
    out = jnp.einsum('bcs,bts->bct', v, attn)                  # (B, C, T)
    return gamma * out + x


if __name__ == "__main__":
    B, C, T = 2, 32, 16
    Cq = C // 8

    key = jax.random.PRNGKey(0)
    kx, k1, k2, k3, k4, k5, k6 = jax.random.split(key, 7)

    x = jax.random.normal(kx, (B, C, T), dtype=jnp.float32)

    # Conv1d(kernel_size=1) weights: (out_channels, in_channels)
    wq = jax.random.normal(k1, (Cq, C), dtype=jnp.float32) * 0.1
    bq = jax.random.normal(k2, (Cq,), dtype=jnp.float32) * 0.1
    wk = jax.random.normal(k3, (Cq, C), dtype=jnp.float32) * 0.1
    bk = jax.random.normal(k4, (Cq,), dtype=jnp.float32) * 0.1
    wv = jax.random.normal(k5, (C, C), dtype=jnp.float32) * 0.1
    bv = jax.random.normal(k6, (C,), dtype=jnp.float32) * 0.1
    # PyTorch initializes gamma to 0 (output == x); use a nonzero value so the
    # attention path is actually exercised.
    gamma = jnp.array([0.5], dtype=jnp.float32)

    y = attention_block(x, wq, bq, wk, bk, wv, bv, gamma)
    jax.block_until_ready(y)

    y_ref = attention_block_ref(x, wq, bq, wk, bk, wv, bv, gamma)
    assert y.shape == (B, C, T)
    err = float(jnp.max(jnp.abs(y - y_ref)))
    # bf16 MXU inputs with f32 accumulation: looser tolerance vs f32 reference.
    assert err < 2e-2, err

    print("KERNEL_OK")
</pallas_src>

<mosaic_0001>
module attributes {stable_mosaic.version = 11 : i64} {
  func.func @attention_block_kernel(%arg0: i32, %arg1: memref<1x32x16xf32, #tpu.memory_space<vmem>>, %arg2: memref<32x384xbf16, #tpu.memory_space<vmem>>, %arg3: memref<1x384xf32, #tpu.memory_space<vmem>>, %arg4: memref<1xf32, #tpu.memory_space<smem>>, %arg5: memref<1x32x16xf32, #tpu.memory_space<vmem>>) attributes {dimension_semantics = [#tpu.dimension_semantics<parallel>], iteration_bounds = array<i64: 2>, scalar_prefetch = 0 : i64, scratch_operands = 0 : i64, tpu.core_type = #tpu.core_type<tc>, window_params = [{transform_indices = @transform_0, window_bounds = array<i64: 1, 32, 16>}, {pipeline_mode = #tpu.pipeline_mode<synchronous>, transform_indices = @transform_1, window_bounds = array<i64: 32, 384>}, {pipeline_mode = #tpu.pipeline_mode<synchronous>, transform_indices = @transform_2, window_bounds = array<i64: 1, 384>}, {transform_indices = @transform_3, window_bounds = array<i64: 1>}, {transform_indices = @transform_4, window_bounds = array<i64: 1, 32, 16>}]} {
    %c0 = arith.constant 0 : index
    %c0_0 = arith.constant 0 : index
    %c0_1 = arith.constant 0 : index
    %0 = vector.load %arg1[%c0, %c0_0, %c0_1] : memref<1x32x16xf32, #tpu.memory_space<vmem>>, vector<1x32x16xf32>
    %1 = tpu.transpose %0, [0, 2, 1] : vector<1x32x16xf32> -> vector<1x16x32xf32>
    %c0_2 = arith.constant 0 : index
    %c0_3 = arith.constant 0 : index
    %2 = vector.load %arg2[%c0_2, %c0_3] : memref<32x384xbf16, #tpu.memory_space<vmem>>, vector<32x384xbf16>
    %c0_4 = arith.constant 0 : index
    %c0_5 = arith.constant 0 : index
    %3 = vector.load %arg3[%c0_4, %c0_5] : memref<1x384xf32, #tpu.memory_space<vmem>>, vector<1x384xf32>
    %4 = arith.truncf %1 : vector<1x16x32xf32> to vector<1x16x32xbf16>
    "tpu.trace_start"() <{level = 10 : i32, message = "btc,co->bto"}> : () -> ()
    %cst = arith.constant dense<0.000000e+00> : vector<1x16x384xf32>
    %5 = tpu.matmul %4, %2, %cst {dimension_numbers = #tpu.dot_dimension_numbers<[2], [0], [0, 1], [1], [0, 0, 0, 1, 1, 1], [], []>} : vector<1x16x32xbf16>, vector<32x384xbf16>, vector<1x16x384xf32> -> vector<1x16x384xf32>
    "tpu.trace_stop"() : () -> ()
    %6 = vector.shape_cast %3 : vector<1x384xf32> to vector<1x1x384xf32>
    %7 = vector.broadcast %6 : vector<1x1x384xf32> to vector<1x16x384xf32>
    %8 = arith.addf %5, %7 : vector<1x16x384xf32>
    %9 = vector.extract_strided_slice %8 {offsets = [0, 0, 0], sizes = [1, 16, 128], strides = [1, 1, 1]} : vector<1x16x384xf32> to vector<1x16x128xf32>
    %10 = vector.extract_strided_slice %8 {offsets = [0, 0, 128], sizes = [1, 16, 128], strides = [1, 1, 1]} : vector<1x16x384xf32> to vector<1x16x128xf32>
    %11 = vector.extract_strided_slice %8 {offsets = [0, 0, 256], sizes = [1, 16, 128], strides = [1, 1, 1]} : vector<1x16x384xf32> to vector<1x16x128xf32>
    %12 = arith.truncf %9 : vector<1x16x128xf32> to vector<1x16x128xbf16>
    %13 = arith.truncf %10 : vector<1x16x128xf32> to vector<1x16x128xbf16>
    "tpu.trace_start"() <{level = 10 : i32, message = "btc,bsc->bts"}> : () -> ()
    %cst_6 = arith.constant dense<0.000000e+00> : vector<1x16x16xf32>
    %14 = tpu.matmul %12, %13, %cst_6 {dimension_numbers = #tpu.dot_dimension_numbers<[2], [2], [1], [1], [0, 0, 0, 1, 1, 1], [0], [0]>} : vector<1x16x128xbf16>, vector<1x16x128xbf16>, vector<1x16x16xf32> -> vector<1x16x16xf32>
    "tpu.trace_stop"() : () -> ()
    %cst_7 = arith.constant dense<0xFF800000> : vector<1x16xf32>
    %15 = vector.multi_reduction <maximumf>, %14, %cst_7 [2] : vector<1x16x16xf32> to vector<1x16xf32>
    %16 = vector.shape_cast %15 : vector<1x16xf32> to vector<1x16x1xf32>
    %17 = vector.broadcast %16 : vector<1x16x1xf32> to vector<1x16x16xf32>
    %18 = arith.subf %14, %17 : vector<1x16x16xf32>
    %19 = math.exp %18 : vector<1x16x16xf32>
    %cst_8 = arith.constant dense<0.000000e+00> : vector<1x16xf32>
    %20 = vector.multi_reduction <add>, %19, %cst_8 [2] : vector<1x16x16xf32> to vector<1x16xf32>
    %21 = vector.shape_cast %20 : vector<1x16xf32> to vector<1x16x1xf32>
    %22 = tpu.reciprocal %21 {approx = true} : vector<1x16x1xf32> -> vector<1x16x1xf32>
    %23 = vector.broadcast %22 : vector<1x16x1xf32> to vector<1x16x16xf32>
    %24 = arith.mulf %19, %23 : vector<1x16x16xf32>
    %25 = arith.truncf %24 : vector<1x16x16xf32> to vector<1x16x16xbf16>
    %26 = arith.truncf %11 : vector<1x16x128xf32> to vector<1x16x128xbf16>
    "tpu.trace_start"() <{level = 10 : i32, message = "bts,bsc->btc"}> : () -> ()
    %cst_9 = arith.constant dense<0.000000e+00> : vector<1x16x128xf32>
    %27 = tpu.matmul %25, %26, %cst_9 {dimension_numbers = #tpu.dot_dimension_numbers<[2], [1], [1], [2], [0, 0, 0, 1, 1, 2], [0], [0]>} : vector<1x16x16xbf16>, vector<1x16x128xbf16>, vector<1x16x128xf32> -> vector<1x16x128xf32>
    "tpu.trace_stop"() : () -> ()
    %c0_10 = arith.constant 0 : index
    %28 = memref.load %arg4[%c0_10] : memref<1xf32, #tpu.memory_space<smem>>
    %29 = vector.extract_strided_slice %27 {offsets = [0, 0, 0], sizes = [1, 16, 32], strides = [1, 1, 1]} : vector<1x16x128xf32> to vector<1x16x32xf32>
    %30 = vector.broadcast %28 : f32 to vector<1x16x32xf32>
    %31 = arith.mulf %30, %29 : vector<1x16x32xf32>
    %32 = arith.addf %31, %1 : vector<1x16x32xf32>
    %33 = tpu.transpose %32, [0, 2, 1] : vector<1x16x32xf32> -> vector<1x32x16xf32>
    %c0_11 = arith.constant 0 : index
    %c0_12 = arith.constant 0 : index
    %c0_13 = arith.constant 0 : index
    %34 = vector.load %arg5[%c0_11, %c0_12, %c0_13] : memref<1x32x16xf32, #tpu.memory_space<vmem>>, vector<1x32x16xf32>
    tpu.vector_store %arg5[%c0_11, %c0_12, %c0_13], %33 {strides = array<i32>} : memref<1x32x16xf32, #tpu.memory_space<vmem>>, vector<1x32x16xf32>,
    return
  }
  func.func @transform_0(%arg0: i32) -> (i32, i32, i32) {
    %c0_i32 = arith.constant 0 : i32
    %c0_i32_0 = arith.constant 0 : i32
    %c0_i32_1 = arith.constant 0 : i32
    return %arg0, %c0_i32, %c0_i32_0 : i32, i32, i32
  }
  func.func @transform_1(%arg0: i32) -> (i32, i32) {
    %c0_i32 = arith.constant 0 : i32
    %c0_i32_0 = arith.constant 0 : i32
    %c0_i32_1 = arith.constant 0 : i32
    return %c0_i32, %c0_i32_0 : i32, i32
  }
  func.func @transform_2(%arg0: i32) -> (i32, i32) {
    %c0_i32 = arith.constant 0 : i32
    %c0_i32_0 = arith.constant 0 : i32
    %c0_i32_1 = arith.constant 0 : i32
    return %c0_i32, %c0_i32_0 : i32, i32
  }
  func.func @transform_3(%arg0: i32) -> i32 {
    %c0_i32 = arith.constant 0 : i32
    %c0_i32_0 = arith.constant 0 : i32
    return %c0_i32 : i32
  }
  func.func @transform_4(%arg0: i32) -> (i32, i32, i32) {
    %c0_i32 = arith.constant 0 : i32
    %c0_i32_0 = arith.constant 0 : i32
    %c0_i32_1 = arith.constant 0 : i32
    return %arg0, %c0_i32, %c0_i32_0 : i32, i32, i32
  }
}

module attributes {stable_mosaic.version = 11 : i64} {
  func.func @attention_block_kernel(%arg0: i32, %arg1: memref<1x32x16xf32, #tpu.memory_space<vmem>>, %arg2: memref<32x384xbf16, #tpu.memory_space<vmem>>, %arg3: memref<1x384xf32, #tpu.memory_space<vmem>>, %arg4: memref<1xf32, #tpu.memory_space<smem>>, %arg5: memref<1x32x16xf32, #tpu.memory_space<vmem>>) attributes {dimension_semantics = [#tpu.dimension_semantics<parallel>], iteration_bounds = array<i64: 2>, scalar_prefetch = 0 : i64, scratch_operands = 0 : i64, tpu.core_type = #tpu.core_type<tc>, window_params = [{transform_indices = @transform_0, window_bounds = array<i64: 1, 32, 16>}, {pipeline_mode = #tpu.pipeline_mode<synchronous>, transform_indices = @transform_1, window_bounds = array<i64: 32, 384>}, {pipeline_mode = #tpu.pipeline_mode<synchronous>, transform_indices = @transform_2, window_bounds = array<i64: 1, 384>}, {transform_indices = @transform_3, window_bounds = array<i64: 1>}, {transform_indices = @transform_4, window_bounds = array<i64: 1, 32, 16>}]} {
    %c0 = arith.constant 0 : index
    %c0_0 = arith.constant 0 : index
    %c0_1 = arith.constant 0 : index
    %0 = vector.load %arg1[%c0, %c0_0, %c0_1] : memref<1x32x16xf32, #tpu.memory_space<vmem>>, vector<1x32x16xf32>
    %1 = tpu.transpose %0, [0, 2, 1] : vector<1x32x16xf32> -> vector<1x16x32xf32>
    %c0_2 = arith.constant 0 : index
    %c0_3 = arith.constant 0 : index
    %2 = vector.load %arg2[%c0_2, %c0_3] : memref<32x384xbf16, #tpu.memory_space<vmem>>, vector<32x384xbf16>
    %c0_4 = arith.constant 0 : index
    %c0_5 = arith.constant 0 : index
    %3 = vector.load %arg3[%c0_4, %c0_5] : memref<1x384xf32, #tpu.memory_space<vmem>>, vector<1x384xf32>
    %4 = arith.truncf %1 : vector<1x16x32xf32> to vector<1x16x32xbf16>
    "tpu.trace_start"() <{level = 10 : i32, message = "btc,co->bto"}> : () -> ()
    %cst = arith.constant dense<0.000000e+00> : vector<1x16x384xf32>
    %5 = tpu.matmul %4, %2, %cst {dimension_numbers = #tpu.dot_dimension_numbers<[2], [0], [0, 1], [1], [0, 0, 0, 1, 1, 1], [], []>} : vector<1x16x32xbf16>, vector<32x384xbf16>, vector<1x16x384xf32> -> vector<1x16x384xf32>
    "tpu.trace_stop"() : () -> ()
    %6 = vector.shape_cast %3 : vector<1x384xf32> to vector<1x1x384xf32>
    %7 = vector.broadcast %6 : vector<1x1x384xf32> to vector<1x16x384xf32>
    %8 = arith.addf %5, %7 : vector<1x16x384xf32>
    %9 = vector.extract_strided_slice %8 {offsets = [0, 0, 0], sizes = [1, 16, 128], strides = [1, 1, 1]} : vector<1x16x384xf32> to vector<1x16x128xf32>
    %10 = vector.extract_strided_slice %8 {offsets = [0, 0, 128], sizes = [1, 16, 128], strides = [1, 1, 1]} : vector<1x16x384xf32> to vector<1x16x128xf32>
    %11 = vector.extract_strided_slice %8 {offsets = [0, 0, 256], sizes = [1, 16, 128], strides = [1, 1, 1]} : vector<1x16x384xf32> to vector<1x16x128xf32>
    %12 = arith.truncf %9 : vector<1x16x128xf32> to vector<1x16x128xbf16>
    %13 = arith.truncf %10 : vector<1x16x128xf32> to vector<1x16x128xbf16>
    "tpu.trace_start"() <{level = 10 : i32, message = "btc,bsc->bts"}> : () -> ()
    %cst_6 = arith.constant dense<0.000000e+00> : vector<1x16x16xf32>
    %14 = tpu.matmul %12, %13, %cst_6 {dimension_numbers = #tpu.dot_dimension_numbers<[2], [2], [1], [1], [0, 0, 0, 1, 1, 1], [0], [0]>} : vector<1x16x128xbf16>, vector<1x16x128xbf16>, vector<1x16x16xf32> -> vector<1x16x16xf32>
    "tpu.trace_stop"() : () -> ()
    %cst_7 = arith.constant dense<0xFF800000> : vector<1x16xf32>
    %15 = vector.multi_reduction <maximumf>, %14, %cst_7 [2] : vector<1x16x16xf32> to vector<1x16xf32>
    %16 = vector.shape_cast %15 : vector<1x16xf32> to vector<1x16x1xf32>
    %17 = vector.broadcast %16 : vector<1x16x1xf32> to vector<1x16x16xf32>
    %18 = arith.subf %14, %17 : vector<1x16x16xf32>
    %19 = math.exp %18 : vector<1x16x16xf32>
    %cst_8 = arith.constant dense<0.000000e+00> : vector<1x16xf32>
    %20 = vector.multi_reduction <add>, %19, %cst_8 [2] : vector<1x16x16xf32> to vector<1x16xf32>
    %21 = vector.shape_cast %20 : vector<1x16xf32> to vector<1x16x1xf32>
    %22 = tpu.reciprocal %21 {approx = true} : vector<1x16x1xf32> -> vector<1x16x1xf32>
    %23 = vector.broadcast %22 : vector<1x16x1xf32> to vector<1x16x16xf32>
    %24 = arith.mulf %19, %23 : vector<1x16x16xf32>
    %25 = arith.truncf %24 : vector<1x16x16xf32> to vector<1x16x16xbf16>
    %26 = arith.truncf %11 : vector<1x16x128xf32> to vector<1x16x128xbf16>
    "tpu.trace_start"() <{level = 10 : i32, message = "bts,bsc->btc"}> : () -> ()
    %cst_9 = arith.constant dense<0.000000e+00> : vector<1x16x128xf32>
    %27 = tpu.matmul %25, %26, %cst_9 {dimension_numbers = #tpu.dot_dimension_numbers<[2], [1], [1], [2], [0, 0, 0, 1, 1, 2], [0], [0]>} : vector<1x16x16xbf16>, vector<1x16x128xbf16>, vector<1x16x128xf32> -> vector<1x16x128xf32>
    "tpu.trace_stop"() : () -> ()
    %c0_10 = arith.constant 0 : index
    %28 = memref.load %arg4[%c0_10] : memref<1xf32, #tpu.memory_space<smem>>
    %29 = vector.extract_strided_slice %27 {offsets = [0, 0, 0], sizes = [1, 16, 32], strides = [1, 1, 1]} : vector<1x16x128xf32> to vector<1x16x32xf32>
    %30 = vector.broadcast %28 : f32 to vector<1x16x32xf32>
    %31 = arith.mulf %30, %29 : vector<1x16x32xf32>
    %32 = arith.addf %31, %1 : vector<1x16x32xf32>
    %33 = tpu.transpose %32, [0, 2, 1] : vector<1x16x32xf32> -> vector<1x32x16xf32>
    %c0_11 = arith.constant 0 : index
    %c0_12 = arith.constant 0 : index
    %c0_13 = arith.constant 0 : index
    %34 = vector.load %arg5[%c0_11, %c0_12, %c0_13] : memref<1x32x16xf32, #tpu.memory_space<vmem>>, vector<1x32x16xf32>
    tpu.vector_store %arg5[%c0_11, %c0_12, %c0_13], %33 {strides = array<i32>} : memref<1x32x16xf32, #tpu.memory_space<vmem>>, vector<1x32x16xf32>,
    return
  }
  func.func @transform_0(%arg0: i32) -> (i32, i32, i32) {
    %c0_i32 = arith.constant 0 : i32
    %c0_i32_0 = arith.constant 0 : i32
    %c0_i32_1 = arith.constant 0 : i32
    return %arg0, %c0_i32, %c0_i32_0 : i32, i32, i32
  }
  func.func @transform_1(%arg0: i32) -> (i32, i32) {
    %c0_i32 = arith.constant 0 : i32
    %c0_i32_0 = arith.constant 0 : i32
    %c0_i32_1 = arith.constant 0 : i32
    return %c0_i32, %c0_i32_0 : i32, i32
  }
  func.func @transform_2(%arg0: i32) -> (i32, i32) {
    %c0_i32 = arith.constant 0 : i32
    %c0_i32_0 = arith.constant 0 : i32
    %c0_i32_1 = arith.constant 0 : i32
    return %c0_i32, %c0_i32_0 : i32, i32
  }
  func.func @transform_3(%arg0: i32) -> i32 {
    %c0_i32 = arith.constant 0 : i32
    %c0_i32_0 = arith.constant 0 : i32
    return %c0_i32 : i32
  }
  func.func @transform_4(%arg0: i32) -> (i32, i32, i32) {
    %c0_i32 = arith.constant 0 : i32
    %c0_i32_0 = arith.constant 0 : i32
    %c0_i32_1 = arith.constant 0 : i32
    return %arg0, %c0_i32, %c0_i32_0 : i32, i32, i32
  }
}

</mosaic_0001>

<bundles_post_ra>
// kernel: tpu_custom_call.1
= control target key start
LH: loop header
LB: loop body
LE: loop exit
PB: predicated region body
PF: predicated region fallthrough
CT: control target
= control target key end

     0   :  { %s619_s17 = smov 0   ;;  %s701_s0 = inlined_call_operand.vmem [shape: f32[2,32,16], index: 0, kind: input, shape index: {}]   ;;  %s702_s1 = inlined_call_operand.vmem [shape: bf16[32,384], index: 1, kind: input, shape index: {}]   ;;  %s703_s2 = inlined_call_operand.vmem [shape: f32[1,384], index: 2, kind: input, shape index: {}]   ;;  %s704_s3 = inlined_call_operand.<no memory space> [shape: f32[1], index: 3, kind: input, shape index: {}]   ;;  %s705_s4 = inlined_call_operand.vmem [shape: f32[2,32,16], index: 4, kind: output, shape index: {}]  }
   0x1   :  { %9 = sst [smem:[#allocation2]] %s704_s3 }
   0x2 LB: > { %s519_s18 = sadd.s32 4294967295, %s589_s17   ;;  %p523_p0 = scmp.ge.s32.totalorder %s589_s17, 1  ;;  %s589_s17 = sphi %s619_s17, %s15_s17  }
   0x3   : > { %p163_p1 = scmp.lt.s32.totalorder %s589_s17, 3 }
   0x5   : > { %p164_p2 = pnand %p523_p0, %p163_p1 }
   0x6   : > { %p189_p3 = scmp.lt.s32.totalorder (!%p164_p2), %s519_s18, 1  ;;  %s422_s24 = sld [smem:[#allocation2]] (!%p164_p2) }
   0x7   : > { %167 = sbr.rel (%p164_p2) target bundleno = 1064 (0x428), region = 36 }
   0xc   : > { %s707_s18 = smov (!%p189_p3, %s519_s18), 1  ;;  %v542_v4 = vld [vmem:[%s702_s1 + $0x18] sm:$0xf]  ;;  %v564_v5 = vld [vmem:[%s702_s1 + $0x20] sm:$0xf0]  ;;  %vm291_vm0 = vcmask 261120  }
   0xd   : > { %s558_s3 = sshll.u32 %s707_s18, 5  ;;  %v563_v6 = vld [vmem:[%s702_s1 + $0x1c] sm:$0xf]  ;;  %v543_v7 = vor.u32 %v564_v5, %v542_v4  ;;  %v544_v8 = vld [vmem:[%s702_s1 + $0x24] sm:$0xf0]  ;;  %vm367_vm1 = vcmask 130048  }
   0xe   : > { %s193_s21 = scalar_lea.vmem %s701_s0, %s558_s3  ;;  %v550_v9 = vld [vmem:[%s702_s1 + $0x20] sm:$0xf]  ;;  %v565_v10 = vld [vmem:[%s702_s1 + $0x28] sm:$0xf0]  ;;  %v547_v11 = vor.u32 %v563_v6, %v544_v8  ;;  %v560_v15 = vld [vmem:[%s702_s1 + $0x4] sm:$0xf]  ;;  %s198_s27 = scalar_lea.vmem %s705_s4, %s558_s3 }
   0xf   : > { %v200_v0 = vld [vmem:[%s193_s21] sm:$0xff]  ;;  %v201_v1 = vld [vmem:[%s193_s21 + $0x8] sm:$0xff]  ;;  %v202_v2 = vld [vmem:[%s193_s21 + $0x10] sm:$0xff]  ;;  %v551_v12 = vor.u32 %v565_v10, %v550_v9  ;;  %301 = vmatpush.bf16.msra.mxu0 %v543_v7 }
  0x10   : > { %204 = vxpose.xlu0.b32.start [1/4] (short) (narrow) %v200_v0, 16  ;;  %v203_v3 = vld [vmem:[%s193_s21 + $0x18] sm:$0xff]  ;;  %315 = vmatpush.bf16.msra.mxu1 %v547_v11  ;;  %v530_v13 = vld [vmem:[%s702_s1] sm:$0xf]  ;;  %v561_v14 = vld [vmem:[%s702_s1 + $0x8] sm:$0xf0] }
  0x11   : > { %329 = vmatpush.bf16.msra.mxu2 %v551_v12  ;;  %v531_v16 = vor.u32 %v561_v14, %v530_v13  ;;  %v532_v17 = vld [vmem:[%s702_s1 + $0xc] sm:$0xf0]  ;;  %v538_v18 = vld [vmem:[%s702_s1 + $0x8] sm:$0xf]  ;;  %v562_v19 = vld [vmem:[%s702_s1 + $0x10] sm:$0xf0] }
  0x12   : > { %v535_v20 = vor.u32 %v560_v15, %v532_v17  ;;  %v539_v21 = vor.u32 %v562_v19, %v538_v18  ;;  %v244_v29 = vld [vmem:[%s703_s2] sm:$0x7] }
  0x13   : > { %302 = vmatpush.bf16.msra.mxu0 %v531_v16  ;;  %v249_v32 = vperm.slane %v244_v29, 1  ;;  %v248_v35 = vperm.slane %v244_v29, 0  ;;  %v250_v36 = vperm.slane %v244_v29, 2 }
  0x14   : > { %316 = vmatpush.bf16.msra.mxu1 %v535_v20 }
  0x15   : > { %330 = vmatpush.bf16.msra.mxu2 %v539_v21  ;;  %v423_v21 = vstv %s422_s24 }
  0x18   : > { %205 = vxpose.xlu0.b32.cont [2/4] (short) (narrow) %v201_v1, 16 }
  0x20   : > { %206 = vxpose.xlu0.b32.cont [3/4] (short) (narrow) %v202_v2, 16 }
  0x28   : > { %207 = vxpose.xlu0.b32.end [4/4] (short) (narrow) %v203_v3, 16 }
  0xb4   : > { %v671_v22 = vpop.trf.xlu0 }
  0xb5   : > { %v245_v23 = vpack.c.bf16 %v671_v22, %v671_v22 }
  0xb7   : > { %v256_v26 = vunpack.c.l.b16 %v245_v23 }
  0xbc   : > { %v675_v24 = vpop.trf.xlu0 }
  0xbd   : > { %v246_v25 = vpack.c.bf16 %v675_v24, %v675_v24 }
  0xbf   : > { %v257_v27 = vunpack.c.l.b16 %v246_v25 }
  0xc1   : > { %v258_v28 = vpack.c.b16 %v257_v27, %v256_v26 }
  0xc3   : > { %552 = vmatmul.msk.bf16.vlgmr.msra.gmra.mxu0 %vm291_vm0, %v258_v28  ;;  %553 = vmatmul.msk.bf16.vlgmr.msra.gmra.mxu1 %vm291_vm0, %v258_v28 }
  0xc4   : > { %554 = vmatmul.msk.bf16.vlgmr.msra.gmra.mxu2 %vm291_vm0, %v258_v28 }
 0x140   : > { %v304_v30 = vpop.f32.mrf.mxu0  ;;  %v318_v31 = vpop.f32.mrf.mxu1 }
 0x141   : > { %v319_v33 = vadd.f32 %v318_v31, %v249_v32  ;;  %v305_v43 = vadd.f32 %v304_v30, %v248_v35 }
 0x143   : > { %v339_v39 = vpack.c.bf16 %v319_v33, %v319_v33  ;;  %v337_v50 = vpack.c.bf16 %v305_v43, %v305_v43 }
 0x145   : > { %v349_v45 = vunpack.c.l.b16 %v339_v39  ;;  %v343_v55 = vunpack.c.l.b16 %v337_v50 }
 0x147   : > { %v332_v34 = vpop.f32.mrf.mxu2 }
 0x148   : > { %v306_v37 = vpop.f32.mrf.mxu0  ;;  %v320_v38 = vpop.f32.mrf.mxu1  ;;  %v333_v44 = vadd.f32 %v332_v34, %v250_v36 }
 0x149   : > { %v321_v40 = vadd.f32 %v320_v38, %v249_v32  ;;  %v307_v41 = vadd.f32 %v306_v37, %v248_v35 }
 0x14a   : > { %v392_v51 = vpack.c.bf16 %v333_v44, %v333_v44 }
 0x14b   : > { %v340_v42 = vpack.c.bf16 %v321_v40, %v321_v40  ;;  %v338_v47 = vpack.c.bf16 %v307_v41, %v307_v41 }
 0x14c   : > { %v401_v56 = vunpack.c.l.b16 %v392_v51 }
 0x14d   : > { %v350_v46 = vunpack.c.l.b16 %v340_v42  ;;  %v344_v53 = vunpack.c.l.b16 %v338_v47 }
 0x14f   : > { %v334_v48 = vpop.f32.mrf.mxu2  ;;  %v351_v49 = vpack.c.b16 %v350_v46, %v349_v45  ;;  %v345_v59 = vpack.c.b16 %v344_v53, %v343_v55 }
 0x150   : > { %v335_v52 = vadd.f32 %v334_v48, %v250_v36 }
 0x151   : > { %360 = vmatpush.bf16.xpose.msra.mxu3 %v351_v49 }
 0x152   : > { %v393_v54 = vpack.c.bf16 %v335_v52, %v335_v52 }
 0x154   : > { %v402_v57 = vunpack.c.l.b16 %v393_v54 }
 0x156   : > { %v403_v58 = vpack.c.b16 %v402_v57, %v401_v56 }
 0x158   : > { %415 = vmatpush.bf16.msrb.mxu0 %v403_v58  ;;  %361 = vmatmul.bf16.vlgmr.msra.gmra.mxu3 %v345_v59 }
 0x1db   : > { %v362_v60 = vpop.f32.mrf.mxu3 }
 0x1dc   : > { %v368_v61 = vsel %vm367_vm1, %v362_v60, -inf }
 0x1dd   : > { %369 = vmax.xlane.f32.xlu1 %v368_v61 }
 0x1e3   : > { %v364_v62 = vpop.f32.mrf.mxu3 }
 0x1e4   : > { %v371_v63 = vsel %vm367_vm1, %v364_v62, -inf }
 0x1e5   : > { %372 = vmax.xlane.f32.xlu1 %v371_v63 }
 0x250   : > { %v370_v0 = vpop.xlane.xlu1 %369 }
 0x251   : > { %v374_v1 = vsub.f32 %v362_v60, %v370_v0 }
 0x253   : > { %v376_v2 = vmul.f32 1.442695, %v374_v1 }
 0x255   : > { %575 = vpow2.f32 %v376_v2 }
 0x258   : > { %v373_v3 = vpop.xlane.xlu1 %372 }
 0x259   : > { %v375_v4 = vsub.f32 %v364_v62, %v373_v3 }
 0x25b   : > { %v576_v5 = vpop.eup %575  ;;  %v378_v6 = vmul.f32 1.442695, %v375_v4 }
 0x25c   : > { %v380_v7 = vsel %vm367_vm1, %v576_v5, 0.0 }
 0x25d   : > { %577 = vpow2.f32 %v378_v6  ;;  %381 = vadd.xlane.f32.xlu2 %v380_v7 }
 0x263   : > { %v578_v8 = vpop.eup %577 }
 0x264   : > { %v383_v9 = vsel %vm367_vm1, %v578_v8, 0.0 }
 0x265   : > { %384 = vadd.xlane.f32.xlu2 %v383_v9 }
 0x2d0   : > { %v382_v10 = vpop.xlane.xlu2 %381 }
 0x2d1   : > { %579 = vrcp.f32 %v382_v10 }
 0x2d7   : > { %v580_v12 = vpop.eup %579 }
 0x2d8   : > { %v385_v11 = vpop.xlane.xlu2 %384  ;;  %v388_v13 = vmul.f32 %v580_v12, %v576_v5 }
 0x2d9   : > { %581 = vrcp.f32 %v385_v11 }
 0x2da   : > { %v390_v15 = vpack.c.bf16 %v388_v13, %v388_v13 }
 0x2dc   : > { %v396_v18 = vunpack.c.l.b16 %v390_v15 }
 0x2df   : > { %v582_v14 = vpop.eup %581 }
 0x2e0   : > { %v389_v16 = vmul.f32 %v582_v14, %v578_v8 }
 0x2e2   : > { %v391_v17 = vpack.c.bf16 %v389_v16, %v389_v16 }
 0x2e4   : > { %v397_v19 = vunpack.c.l.b16 %v391_v17 }
 0x2e6   : > { %v398_v20 = vpack.c.b16 %v397_v19, %v396_v18 }
 0x2e8   : > { %555 = vmatmul.msk.bf16.vlgmr.msrb.gmra.mxu0 %vm367_vm1, %v398_v20 }
 0x365   : > { %v417_v23 = vpop.f32.mrf.mxu0 }
 0x366   : > { %v424_v25 = vmul.f32 %v423_v21, %v417_v23 }
 0x368   : > { %v426_v26 = vadd.f32 %v424_v25, %v671_v22 }
 0x36a   : > { %428 = vxpose.xlu1.b32.start [1/2] (short) (narrow) %v426_v26, 32 }
 0x36d   : > { %v419_v27 = vpop.f32.mrf.mxu0 }
 0x36e   : > { %v425_v28 = vmul.f32 %v423_v21, %v419_v27 }
 0x370   : > { %v427_v29 = vadd.f32 %v425_v28, %v675_v24 }
 0x372   : > { %429 = vxpose.xlu1.b32.end [2/2] (short) (narrow) %v427_v29, 32 }
 0x40e   : > { %v444_v30 = vpop.trf.xlu1 }
 0x40f   : > { %460 = vst.msk [vmem:[%s198_s27] sm:$0xff] %vm367_vm1, %v444_v30 }
 0x416   : > { %v445_v31 = vpop.trf.xlu1 }
 0x417   : > { %461 = vst.msk [vmem:[%s198_s27 + $0x8] sm:$0xff] %vm367_vm1, %v445_v31 }
 0x41e   : > { %v446_v32 = vpop.trf.xlu1 }
 0x41f   : > { %462 = vst.msk [vmem:[%s198_s27 + $0x10] sm:$0xff] %vm367_vm1, %v446_v32 }
 0x426   : > { %v447_v22 = vpop.trf.xlu1 }
 0x427   : > { %463 = vst.msk [vmem:[%s198_s27 + $0x18] sm:$0xff] %vm367_vm1, %v447_v22 }
 0x428 PF: > { %s15_s17 = sadd.s32 1, %s589_s17  }
 0x429   : > { %p12_p4 = scmp.ge.s32.totalorder %s15_s17, 4  }
 0x42b   :  { %14 = sbr.rel (!%p12_p4) target bundleno = 2 (0x2), region = 66 }

// kernel: tpu_custom_call.1
= control target key start
LH: loop header
LB: loop body
LE: loop exit
PB: predicated region body
PF: predicated region fallthrough
CT: control target
= control target key end

     0   :  { %s619_s17 = smov 0   ;;  %s701_s0 = inlined_call_operand.vmem [shape: f32[2,32,16], index: 0, kind: input, shape index: {}]   ;;  %s702_s1 = inlined_call_operand.vmem [shape: bf16[32,384], index: 1, kind: input, shape index: {}]   ;;  %s703_s2 = inlined_call_operand.vmem [shape: f32[1,384], index: 2, kind: input, shape index: {}]   ;;  %s704_s3 = inlined_call_operand.<no memory space> [shape: f32[1], index: 3, kind: input, shape index: {}]   ;;  %s705_s4 = inlined_call_operand.vmem [shape: f32[2,32,16], index: 4, kind: output, shape index: {}]  }
   0x1   :  { %9 = sst [smem:[#allocation2]] %s704_s3 }
   0x2 LB: > { %s519_s18 = sadd.s32 4294967295, %s589_s17   ;;  %p523_p0 = scmp.ge.s32.totalorder %s589_s17, 1  ;;  %s589_s17 = sphi %s619_s17, %s15_s17  }
   0x3   : > { %p163_p1 = scmp.lt.s32.totalorder %s589_s17, 3 }
   0x5   : > { %p164_p2 = pnand %p523_p0, %p163_p1 }
   0x6   : > { %p189_p3 = scmp.lt.s32.totalorder (!%p164_p2), %s519_s18, 1  ;;  %s422_s24 = sld [smem:[#allocation2]] (!%p164_p2) }
   0x7   : > { %167 = sbr.rel (%p164_p2) target bundleno = 1064 (0x428), region = 36 }
   0xc   : > { %s707_s18 = smov (!%p189_p3, %s519_s18), 1  ;;  %v542_v4 = vld [vmem:[%s702_s1 + $0x18] sm:$0xf]  ;;  %v564_v5 = vld [vmem:[%s702_s1 + $0x20] sm:$0xf0]  ;;  %vm291_vm0 = vcmask 261120  }
   0xd   : > { %s558_s3 = sshll.u32 %s707_s18, 5  ;;  %v563_v6 = vld [vmem:[%s702_s1 + $0x1c] sm:$0xf]  ;;  %v543_v7 = vor.u32 %v564_v5, %v542_v4  ;;  %v544_v8 = vld [vmem:[%s702_s1 + $0x24] sm:$0xf0]  ;;  %vm367_vm1 = vcmask 130048  }
   0xe   : > { %s193_s21 = scalar_lea.vmem %s701_s0, %s558_s3  ;;  %v550_v9 = vld [vmem:[%s702_s1 + $0x20] sm:$0xf]  ;;  %v565_v10 = vld [vmem:[%s702_s1 + $0x28] sm:$0xf0]  ;;  %v547_v11 = vor.u32 %v563_v6, %v544_v8  ;;  %v560_v15 = vld [vmem:[%s702_s1 + $0x4] sm:$0xf]  ;;  %s198_s27 = scalar_lea.vmem %s705_s4, %s558_s3 }
   0xf   : > { %v200_v0 = vld [vmem:[%s193_s21] sm:$0xff]  ;;  %v201_v1 = vld [vmem:[%s193_s21 + $0x8] sm:$0xff]  ;;  %v202_v2 = vld [vmem:[%s193_s21 + $0x10] sm:$0xff]  ;;  %v551_v12 = vor.u32 %v565_v10, %v550_v9  ;;  %301 = vmatpush.bf16.msra.mxu0 %v543_v7 }
  0x10   : > { %204 = vxpose.xlu0.b32.start [1/4] (short) (narrow) %v200_v0, 16  ;;  %v203_v3 = vld [vmem:[%s193_s21 + $0x18] sm:$0xff]  ;;  %315 = vmatpush.bf16.msra.mxu1 %v547_v11  ;;  %v530_v13 = vld [vmem:[%s702_s1] sm:$0xf]  ;;  %v561_v14 = vld [vmem:[%s702_s1 + $0x8] sm:$0xf0] }
  0x11   : > { %329 = vmatpush.bf16.msra.mxu2 %v551_v12  ;;  %v531_v16 = vor.u32 %v561_v14, %v530_v13  ;;  %v532_v17 = vld [vmem:[%s702_s1 + $0xc] sm:$0xf0]  ;;  %v538_v18 = vld [vmem:[%s702_s1 + $0x8] sm:$0xf]  ;;  %v562_v19 = vld [vmem:[%s702_s1 + $0x10] sm:$0xf0] }
  0x12   : > { %v535_v20 = vor.u32 %v560_v15, %v532_v17  ;;  %v539_v21 = vor.u32 %v562_v19, %v538_v18  ;;  %v244_v29 = vld [vmem:[%s703_s2] sm:$0x7] }
  0x13   : > { %302 = vmatpush.bf16.msra.mxu0 %v531_v16  ;;  %v249_v32 = vperm.slane %v244_v29, 1  ;;  %v248_v35 = vperm.slane %v244_v29, 0  ;;  %v250_v36 = vperm.slane %v244_v29, 2 }
  0x14   : > { %316 = vmatpush.bf16.msra.mxu1 %v535_v20 }
  0x15   : > { %330 = vmatpush.bf16.msra.mxu2 %v539_v21  ;;  %v423_v21 = vstv %s422_s24 }
  0x18   : > { %205 = vxpose.xlu0.b32.cont [2/4] (short) (narrow) %v201_v1, 16 }
  0x20   : > { %206 = vxpose.xlu0.b32.cont [3/4] (short) (narrow) %v202_v2, 16 }
  0x28   : > { %207 = vxpose.xlu0.b32.end [4/4] (short) (narrow) %v203_v3, 16 }
  0xb4   : > { %v671_v22 = vpop.trf.xlu0 }
  0xb5   : > { %v245_v23 = vpack.c.bf16 %v671_v22, %v671_v22 }
  0xb7   : > { %v256_v26 = vunpack.c.l.b16 %v245_v23 }
  0xbc   : > { %v675_v24 = vpop.trf.xlu0 }
  0xbd   : > { %v246_v25 = vpack.c.bf16 %v675_v24, %v675_v24 }
  0xbf   : > { %v257_v27 = vunpack.c.l.b16 %v246_v25 }
  0xc1   : > { %v258_v28 = vpack.c.b16 %v257_v27, %v256_v26 }
  0xc3   : > { %552 = vmatmul.msk.bf16.vlgmr.msra.gmra.mxu0 %vm291_vm0, %v258_v28  ;;  %553 = vmatmul.msk.bf16.vlgmr.msra.gmra.mxu1 %vm291_vm0, %v258_v28 }
  0xc4   : > { %554 = vmatmul.msk.bf16.vlgmr.msra.gmra.mxu2 %vm291_vm0, %v258_v28 }
 0x140   : > { %v304_v30 = vpop.f32.mrf.mxu0  ;;  %v318_v31 = vpop.f32.mrf.mxu1 }
 0x141   : > { %v319_v33 = vadd.f32 %v318_v31, %v249_v32  ;;  %v305_v43 = vadd.f32 %v304_v30, %v248_v35 }
 0x143   : > { %v339_v39 = vpack.c.bf16 %v319_v33, %v319_v33  ;;  %v337_v50 = vpack.c.bf16 %v305_v43, %v305_v43 }
 0x145   : > { %v349_v45 = vunpack.c.l.b16 %v339_v39  ;;  %v343_v55 = vunpack.c.l.b16 %v337_v50 }
 0x147   : > { %v332_v34 = vpop.f32.mrf.mxu2 }
 0x148   : > { %v306_v37 = vpop.f32.mrf.mxu0  ;;  %v320_v38 = vpop.f32.mrf.mxu1  ;;  %v333_v44 = vadd.f32 %v332_v34, %v250_v36 }
 0x149   : > { %v321_v40 = vadd.f32 %v320_v38, %v249_v32  ;;  %v307_v41 = vadd.f32 %v306_v37, %v248_v35 }
 0x14a   : > { %v392_v51 = vpack.c.bf16 %v333_v44, %v333_v44 }
 0x14b   : > { %v340_v42 = vpack.c.bf16 %v321_v40, %v321_v40  ;;  %v338_v47 = vpack.c.bf16 %v307_v41, %v307_v41 }
 0x14c   : > { %v401_v56 = vunpack.c.l.b16 %v392_v51 }
 0x14d   : > { %v350_v46 = vunpack.c.l.b16 %v340_v42  ;;  %v344_v53 = vunpack.c.l.b16 %v338_v47 }
 0x14f   : > { %v334_v48 = vpop.f32.mrf.mxu2  ;;  %v351_v49 = vpack.c.b16 %v350_v46, %v349_v45  ;;  %v345_v59 = vpack.c.b16 %v344_v53, %v343_v55 }
 0x150   : > { %v335_v52 = vadd.f32 %v334_v48, %v250_v36 }
 0x151   : > { %360 = vmatpush.bf16.xpose.msra.mxu3 %v351_v49 }
 0x152   : > { %v393_v54 = vpack.c.bf16 %v335_v52, %v335_v52 }
 0x154   : > { %v402_v57 = vunpack.c.l.b16 %v393_v54 }
 0x156   : > { %v403_v58 = vpack.c.b16 %v402_v57, %v401_v56 }
 0x158   : > { %415 = vmatpush.bf16.msrb.mxu0 %v403_v58  ;;  %361 = vmatmul.bf16.vlgmr.msra.gmra.mxu3 %v345_v59 }
 0x1db   : > { %v362_v60 = vpop.f32.mrf.mxu3 }
 0x1dc   : > { %v368_v61 = vsel %vm367_vm1, %v362_v60, -inf }
 0x1dd   : > { %369 = vmax.xlane.f32.xlu1 %v368_v61 }
 0x1e3   : > { %v364_v62 = vpop.f32.mrf.mxu3 }
 0x1e4   : > { %v371_v63 = vsel %vm367_vm1, %v364_v62, -inf }
 0x1e5   : > { %372 = vmax.xlane.f32.xlu1 %v371_v63 }
 0x250   : > { %v370_v0 = vpop.xlane.xlu1 %369 }
 0x251   : > { %v374_v1 = vsub.f32 %v362_v60, %v370_v0 }
 0x253   : > { %v376_v2 = vmul.f32 1.442695, %v374_v1 }
 0x255   : > { %575 = vpow2.f32 %v376_v2 }
 0x258   : > { %v373_v3 = vpop.xlane.xlu1 %372 }
 0x259   : > { %v375_v4 = vsub.f32 %v364_v62, %v373_v3 }
 0x25b   : > { %v576_v5 = vpop.eup %575  ;;  %v378_v6 = vmul.f32 1.442695, %v375_v4 }
 0x25c   : > { %v380_v7 = vsel %vm367_vm1, %v576_v5, 0.0 }
 0x25d   : > { %577 = vpow2.f32 %v378_v6  ;;  %381 = vadd.xlane.f32.xlu2 %v380_v7 }
 0x263   : > { %v578_v8 = vpop.eup %577 }
 0x264   : > { %v383_v9 = vsel %vm367_vm1, %v578_v8, 0.0 }
 0x265   : > { %384 = vadd.xlane.f32.xlu2 %v383_v9 }
 0x2d0   : > { %v382_v10 = vpop.xlane.xlu2 %381 }
 0x2d1   : > { %579 = vrcp.f32 %v382_v10 }
 0x2d7   : > { %v580_v12 = vpop.eup %579 }
 0x2d8   : > { %v385_v11 = vpop.xlane.xlu2 %384  ;;  %v388_v13 = vmul.f32 %v580_v12, %v576_v5 }
 0x2d9   : > { %581 = vrcp.f32 %v385_v11 }
 0x2da   : > { %v390_v15 = vpack.c.bf16 %v388_v13, %v388_v13 }
 0x2dc   : > { %v396_v18 = vunpack.c.l.b16 %v390_v15 }
 0x2df   : > { %v582_v14 = vpop.eup %581 }
 0x2e0   : > { %v389_v16 = vmul.f32 %v582_v14, %v578_v8 }
 0x2e2   : > { %v391_v17 = vpack.c.bf16 %v389_v16, %v389_v16 }
 0x2e4   : > { %v397_v19 = vunpack.c.l.b16 %v391_v17 }
 0x2e6   : > { %v398_v20 = vpack.c.b16 %v397_v19, %v396_v18 }
 0x2e8   : > { %555 = vmatmul.msk.bf16.vlgmr.msrb.gmra.mxu0 %vm367_vm1, %v398_v20 }
 0x365   : > { %v417_v23 = vpop.f32.mrf.mxu0 }
 0x366   : > { %v424_v25 = vmul.f32 %v423_v21, %v417_v23 }
 0x368   : > { %v426_v26 = vadd.f32 %v424_v25, %v671_v22 }
 0x36a   : > { %428 = vxpose.xlu1.b32.start [1/2] (short) (narrow) %v426_v26, 32 }
 0x36d   : > { %v419_v27 = vpop.f32.mrf.mxu0 }
 0x36e   : > { %v425_v28 = vmul.f32 %v423_v21, %v419_v27 }
 0x370   : > { %v427_v29 = vadd.f32 %v425_v28, %v675_v24 }
 0x372   : > { %429 = vxpose.xlu1.b32.end [2/2] (short) (narrow) %v427_v29, 32 }
 0x40e   : > { %v444_v30 = vpop.trf.xlu1 }
 0x40f   : > { %460 = vst.msk [vmem:[%s198_s27] sm:$0xff] %vm367_vm1, %v444_v30 }
 0x416   : > { %v445_v31 = vpop.trf.xlu1 }
 0x417   : > { %461 = vst.msk [vmem:[%s198_s27 + $0x8] sm:$0xff] %vm367_vm1, %v445_v31 }
 0x41e   : > { %v446_v32 = vpop.trf.xlu1 }
 0x41f   : > { %462 = vst.msk [vmem:[%s198_s27 + $0x10] sm:$0xff] %vm367_vm1, %v446_v32 }
 0x426   : > { %v447_v22 = vpop.trf.xlu1 }
 0x427   : > { %463 = vst.msk [vmem:[%s198_s27 + $0x18] sm:$0xff] %vm367_vm1, %v447_v22 }
 0x428 PF: > { %s15_s17 = sadd.s32 1, %s589_s17  }
 0x429   : > { %p12_p4 = scmp.ge.s32.totalorder %s15_s17, 4  }
 0x42b   :  { %14 = sbr.rel (!%p12_p4) target bundleno = 2 (0x2), region = 66 }

</bundles_post_ra>
